<compile_context>
chip_gen: v6e
topology: v6e:2x2x1
jax: 0.10.0
libtpu: 0.0.40
codegen_flags: <defaults>
</compile_context>

<pallas_src>
import functools

import jax
import jax.numpy as jnp
from jax.experimental import pallas as pl
from jax.experimental.pallas import tpu as pltpu


def _dice_sums_kernel(*refs, num_preds, steps, block_rows, rows_valid,
                      mask_threshold):
    """Accumulates per-batch, per-lane partial sums into the output block.

    refs = (pred_0, ..., pred_{P-1}, labels, out)
      pred_i / labels blocks : (N, block_rows, 128), native dtype
      out block              : (1, (2*P+1)*N, 128) f32, resident across the
                               'arbitrary' grid axis (accumulator pattern).
        rows [2i*N   : (2i+1)*N] -> partial sum of pred_i * labels
        rows [(2i+1)*N:(2i+2)*N] -> partial sum of pred_i
        rows [2P*N   : (2P+1)*N] -> partial sum of labels
    """
    pred_refs = refs[:num_preds]
    lab_ref = refs[num_preds]
    out_ref = refs[num_preds + 1]

    n = lab_ref.shape[0]
    c = pl.program_id(0)
    k = pl.program_id(1)
    g = c * steps + k                                # global row-block index

    @pl.when(k == 0)
    def _init():
        out_ref[...] = jnp.zeros_like(out_ref)

    def accumulate(mask_rows):
        if mask_rows:
            # 2-D-style (1, tr, 128) row mask, broadcast over the batch axis.
            row = jax.lax.broadcasted_iota(jnp.int32, (1, block_rows, 128), 1)
            valid = (row + g * block_rows) < rows_valid
        l3 = lab_ref[...].astype(jnp.float32)        # (n, tr, 128)
        if mask_rows:
            l3 = jnp.where(valid, l3, 0.0)
        for i in range(num_preds):
            p3 = pred_refs[i][...].astype(jnp.float32)
            if mask_rows:
                p3 = jnp.where(valid, p3, 0.0)
            out_ref[0, (2 * i) * n:(2 * i + 1) * n, :] += jnp.sum(
                p3 * l3, axis=1)
            out_ref[0, (2 * i + 1) * n:(2 * i + 2) * n, :] += jnp.sum(
                p3, axis=1)
        out_ref[0, 2 * num_preds * n:(2 * num_preds + 1) * n, :] += jnp.sum(
            l3, axis=1)

    if mask_threshold is None:
        # No partial row block and no phantom blocks: always mask-free.
        accumulate(False)
    else:
        @pl.when(g < mask_threshold)
        def _fast():
            accumulate(False)

        @pl.when(g >= mask_threshold)
        def _boundary():
            accumulate(True)


def _flatten_lane_major(x, n, d):
    """(N, ...) -> (N, R, 128) row-major view; pads only if D % 128 != 0."""
    x2 = x.reshape(n, d)
    rem = d % 128
    if rem:
        # TODO(synk): ragged-D fallback still pads the feature dim (zeros do
        # not change any of the three sums); replacing this with in-kernel
        # lane masking of the final partial 128-chunk would remove one fused
        # reshape+pad pass.  The aligned common case takes the fast path.
        x2 = jnp.pad(x2, ((0, 0), (0, 128 - rem)))
    return x2.reshape(n, -1, 128)


def _hw_info():
    """(num_tensorcores, vmem_capacity_bytes) with conservative fallbacks."""
    vmem_cap = 64 * 2**20          # conservative default (v7x per-TC VMEM)
    try:
        info = pltpu.get_tpu_info()
        for name in ("vmem_capacity_bytes", "vmem_size_bytes", "vmem_bytes"):
            v = getattr(info, name, None)
            if isinstance(v, int) and v > 0:
                vmem_cap = v
                break
    except Exception:
        pass
    num_cores = 1
    try:
        kind = jax.devices()[0].device_kind.lower().replace(" ", "")
        # Megacore (v4 / v5p) and dual-TensorCore (v7x) chips.
        if ("v4" in kind) or ("v5p" in kind) or ("v7" in kind):
            num_cores = 2
    except Exception:
        pass
    return num_cores, vmem_cap


def dice_loss2(preds, labels, smooth=1.0, aux_weights=(1.0, 0.4, 0.4),
               max_block_rows=None):
    """Forward pass of DiceLoss2 (single tensor or aux-weighted tuple)."""
    if isinstance(preds, tuple):
        pairs = list(zip(preds, aux_weights))       # zip-truncation as in ref
    else:
        pairs = [(preds, 1.0)]
    pred_list = [p for p, _ in pairs]
    weights = [float(w) for _, w in pairs]
    num_preds = len(pred_list)
    num_inputs = num_preds + 1
    n_sums = 2 * num_preds + 1

    n = labels.shape[0]
    d = 1
    for s in labels.shape[1:]:
        d *= int(s)

    lab3 = _flatten_lane_major(labels, n, d)
    preds3 = [_flatten_lane_major(p, n, d) for p in pred_list]
    rows = lab3.shape[1]                 # R rows of 128 lanes per batch item

    num_cores, vmem_cap = _hw_info()
    vmem_limit = int(min(64 * 2**20, max(32 * 2**20, (vmem_cap * 3) // 4)))
    budget = (vmem_limit * 3) // 4       # headroom under the scoped limit

    # Native-dtype double-buffered inputs + ~4 full-block f32 temporaries
    # (cast labels, cast pred, product, mask) per "row of 128 lanes".
    itembytes = (sum(jnp.dtype(p.dtype).itemsize for p in pred_list)
                 + jnp.dtype(labels.dtype).itemsize)
    bytes_per_row = n * 128 * (2 * itembytes + 4 * 4)
    tr = budget // bytes_per_row
    if max_block_rows is not None:
        tr = min(tr, int(max_block_rows))
    tr = (tr // 32) * 32                 # keep native 16/32-packed sublane tiling
    if tr <= 0:
        tr = 8

    streamed_bytes = n * rows * 128 * itembytes
    if tr >= rows:
        tr = rows
        # Dual-TC chips: force >=2 row blocks for non-trivial streams so both
        # TensorCores share the HBM read.
        if num_cores >= 2 and streamed_bytes > (2 * 2**20) and rows >= 64:
            tr = (((rows + 1) // 2 + 31) // 32) * 32
            if tr >= rows:
                tr = rows

    num_blocks = -(-rows // tr)
    splits = num_cores if (num_cores >= 2 and num_blocks >= 2) else 1
    steps = -(-num_blocks // splits)
    covered = splits * steps
    last_block = num_blocks - 1

    ragged_rows = (rows % tr) != 0
    has_phantom = covered > num_blocks
    if ragged_rows:
        mask_threshold = last_block      # mask last real block + phantoms
    elif has_phantom:
        mask_threshold = num_blocks      # mask phantom blocks only
    else:
        mask_threshold = None            # no masking anywhere

    if has_phantom:
        # Phantom blocks past the end: clamp the DMA to the last real block;
        # the in-kernel row mask zeroes their contribution.
        def in_map(c, k):
            return (0, jnp.minimum(c * steps + k, last_block), 0)
    else:
        def in_map(c, k):
            return (0, c * steps + k, 0)

    kernel = functools.partial(
        _dice_sums_kernel, num_preds=num_preds, steps=steps, block_rows=tr,
        rows_valid=rows, mask_threshold=mask_threshold)

    partials = pl.pallas_call(
        kernel,
        out_shape=jax.ShapeDtypeStruct((splits, n_sums * n, 128), jnp.float32),
        grid_spec=pltpu.PrefetchScalarGridSpec(
            num_scalar_prefetch=0,
            grid=(splits, steps),
            in_specs=[pl.BlockSpec((n, tr, 128), in_map)
                      for _ in range(num_inputs)],
            out_specs=pl.BlockSpec((1, n_sums * n, 128),
                                   lambda c, k: (c, 0, 0)),
        ),
        compiler_params=pltpu.CompilerParams(
            dimension_semantics=("parallel", "arbitrary"),
            vmem_limit_bytes=vmem_limit),
    )(*preds3, lab3)

    # Tiny epilogue in plain JAX: cross-split + cross-lane reduce, dice math.
    sums = jnp.sum(partials, axis=(0, 2)).reshape(n_sums, n)   # (n_sums, N)
    lsum = sums[n_sums - 1]
    smooth_f = jnp.float32(smooth)
    total = jnp.zeros((), jnp.float32)
    for i, w in enumerate(weights):
        inter = sums[2 * i]
        psum = sums[2 * i + 1]
        dice = (2.0 * inter + smooth_f) / (psum + lsum + smooth_f)
        total = total + jnp.float32(w) * jnp.mean(1.0 - dice)
    return total


def _reference(preds, labels, smooth=1.0, aux_weights=(1.0, 0.4, 0.4)):
    def single(p, l):
        nb = p.shape[0]
        p_ = p.reshape(nb, -1).astype(jnp.float32)
        l_ = l.reshape(nb, -1).astype(jnp.float32)
        inter = (p_ * l_).sum(1)
        score = (2.0 * inter + smooth) / (p_.sum(1) + l_.sum(1) + smooth)
        return (1.0 - score).mean()

    if isinstance(preds, tuple):
        return sum(w * single(p, labels) for p, w in zip(preds, aux_weights))
    return single(preds, labels)


if __name__ == "__main__":
    key = jax.random.PRNGKey(0)
    k1, k2, k3, k4, k5, k6 = jax.random.split(key, 6)

    # Segmentation-head shapes: NCHW = (2, 4, 16, 16) -> D = 1024 (aligned).
    N, C, H, W = 2, 4, 16, 16
    preds_main = jax.random.normal(k1, (N, C, H, W), dtype=jnp.float32)
    preds_aux1 = jax.random.normal(k2, (N, C, H, W), dtype=jnp.float32)
    preds_aux2 = jax.random.normal(k3, (N, C, H, W), dtype=jnp.float32)
    labels = (jax.random.uniform(k4, (N, C, H, W)) > 0.5).astype(jnp.float32)

    # 1) Single-tensor path.
    got = jax.block_until_ready(dice_loss2(preds_main, labels))
    want = _reference(preds_main, labels)
    assert jnp.allclose(got, want, rtol=1e-5, atol=1e-5), (got, want)

    # 2) Fused tuple (aux-weighted) path: one kernel, labels read once.
    preds_tuple = (preds_main, preds_aux1, preds_aux2)
    got_t = jax.block_until_ready(dice_loss2(preds_tuple, labels))
    want_t = _reference(preds_tuple, labels)
    assert jnp.allclose(got_t, want_t, rtol=1e-5, atol=1e-5), (got_t, want_t)

    # 3) Multi-block path with a ragged last row block (rows = 17, tr = 8),
    #    which also exercises the phantom-block path on dual-TC chips.
    p3 = jax.random.normal(k5, (2, 2, 32, 34), dtype=jnp.float32)
    l3 = (jax.random.uniform(k6, (2, 2, 32, 34)) > 0.5).astype(jnp.float32)
    got3 = jax.block_until_ready(dice_loss2(p3, l3, max_block_rows=8))
    want3 = _reference(p3, l3)
    assert jnp.allclose(got3, want3, rtol=1e-5, atol=1e-5), (got3, want3)

    # 4) Ragged-D fallback (D = 300, not a multiple of 128).
    p4 = jax.random.normal(k1, (2, 3, 10, 10), dtype=jnp.float32)
    l4 = (jax.random.uniform(k2, (2, 3, 10, 10)) > 0.5).astype(jnp.float32)
    got4 = jax.block_until_ready(dice_loss2(p4, l4))
    want4 = _reference(p4, l4)
    assert jnp.allclose(got4, want4, rtol=1e-5, atol=1e-5), (got4, want4)

    # 5) bf16 inputs: native-dtype streaming, f32 accumulation in-kernel.
    got5 = jax.block_until_ready(
        dice_loss2(preds_main.astype(jnp.bfloat16),
                   labels.astype(jnp.bfloat16)))
    want5 = _reference(preds_main.astype(jnp.bfloat16),
                       labels.astype(jnp.bfloat16))
    assert jnp.allclose(got5, want5, rtol=1e-4, atol=1e-4), (got5, want5)

    print("KERNEL_OK")
</pallas_src>

<mosaic_0001>
module attributes {stable_mosaic.version = 11 : i64} {
  func.func @_dice_sums_kernel(%arg0: i32, %arg1: i32, %arg2: memref<2x8x128xf32, #tpu.memory_space<vmem>>, %arg3: memref<2x8x128xf32, #tpu.memory_space<vmem>>, %arg4: memref<1x6x128xf32, #tpu.memory_space<vmem>>) attributes {dimension_semantics = [#tpu.dimension_semantics<parallel>, #tpu.dimension_semantics<arbitrary>], iteration_bounds = array<i64: 1, 1>, scalar_prefetch = 0 : i64, scratch_operands = 0 : i64, tpu.core_type = #tpu.core_type<tc>, window_params = [{transform_indices = @transform_0, window_bounds = array<i64: 2, 8, 128>}, {transform_indices = @transform_1, window_bounds = array<i64: 2, 8, 128>}, {transform_indices = @transform_2, window_bounds = array<i64: 1, 6, 128>}]} {
    %c0_i32 = arith.constant 0 : i32
    %0 = arith.cmpi eq, %arg1, %c0_i32 : i32
    %1 = arith.extui %0 : i1 to i32
    %c0_i32_0 = arith.constant 0 : i32
    %2 = arith.cmpi ne, %1, %c0_i32_0 : i32
    scf.if %2 {
      %cst_24 = arith.constant 0.000000e+00 : f32
      %27 = vector.broadcast %cst_24 : f32 to vector<1x6x128xf32>
      %c0_25 = arith.constant 0 : index
      %c0_26 = arith.constant 0 : index
      %c0_27 = arith.constant 0 : index
      %28 = vector.load %arg4[%c0_25, %c0_26, %c0_27] : memref<1x6x128xf32, #tpu.memory_space<vmem>>, vector<1x6x128xf32>
      tpu.vector_store %arg4[%c0_25, %c0_26, %c0_27], %27 {strides = array<i32>} : memref<1x6x128xf32, #tpu.memory_space<vmem>>, vector<1x6x128xf32>,
    } else {
    }
    %c0 = arith.constant 0 : index
    %c0_1 = arith.constant 0 : index
    %c0_2 = arith.constant 0 : index
    %3 = vector.load %arg3[%c0, %c0_1, %c0_2] : memref<2x8x128xf32, #tpu.memory_space<vmem>>, vector<2x8x128xf32>
    %c0_3 = arith.constant 0 : index
    %c0_4 = arith.constant 0 : index
    %c0_5 = arith.constant 0 : index
    %4 = vector.load %arg2[%c0_3, %c0_4, %c0_5] : memref<2x8x128xf32, #tpu.memory_space<vmem>>, vector<2x8x128xf32>
    %c0_6 = arith.constant 0 : index
    %c0_7 = arith.constant 0 : index
    %c0_8 = arith.constant 0 : index
    %5 = vector.load %arg4[%c0_6, %c0_7, %c0_8] : memref<1x6x128xf32, #tpu.memory_space<vmem>>, vector<1x2x128xf32>
    %6 = vector.shape_cast %5 : vector<1x2x128xf32> to vector<2x128xf32>
    %7 = arith.mulf %4, %3 : vector<2x8x128xf32>
    %cst = arith.constant dense<0.000000e+00> : vector<2x128xf32>
    %8 = vector.multi_reduction <add>, %7, %cst [1] : vector<2x8x128xf32> to vector<2x128xf32>
    %9 = arith.addf %6, %8 : vector<2x128xf32>
    %c0_9 = arith.constant 0 : index
    %c0_10 = arith.constant 0 : index
    %c0_11 = arith.constant 0 : index
    %10 = vector.load %arg4[%c0_9, %c0_10, %c0_11] : memref<1x6x128xf32, #tpu.memory_space<vmem>>, vector<1x2x128xf32>
    %11 = vector.shape_cast %10 : vector<1x2x128xf32> to vector<2x128xf32>
    %12 = vector.shape_cast %9 : vector<2x128xf32> to vector<1x2x128xf32>
    tpu.vector_store %arg4[%c0_9, %c0_10, %c0_11], %12 {strides = array<i32>} : memref<1x6x128xf32, #tpu.memory_space<vmem>>, vector<1x2x128xf32>,
    %c0_12 = arith.constant 0 : index
    %c2 = arith.constant 2 : index
    %c0_13 = arith.constant 0 : index
    %13 = vector.load %arg4[%c0_12, %c2, %c0_13] : memref<1x6x128xf32, #tpu.memory_space<vmem>>, vector<1x2x128xf32>
    %14 = vector.shape_cast %13 : vector<1x2x128xf32> to vector<2x128xf32>
    %cst_14 = arith.constant dense<0.000000e+00> : vector<2x128xf32>
    %15 = vector.multi_reduction <add>, %4, %cst_14 [1] : vector<2x8x128xf32> to vector<2x128xf32>
    %16 = arith.addf %14, %15 : vector<2x128xf32>
    %c0_15 = arith.constant 0 : index
    %c2_16 = arith.constant 2 : index
    %c0_17 = arith.constant 0 : index
    %17 = vector.load %arg4[%c0_15, %c2_16, %c0_17] : memref<1x6x128xf32, #tpu.memory_space<vmem>>, vector<1x2x128xf32>
    %18 = vector.shape_cast %17 : vector<1x2x128xf32> to vector<2x128xf32>
    %19 = vector.shape_cast %16 : vector<2x128xf32> to vector<1x2x128xf32>
    tpu.vector_store %arg4[%c0_15, %c2_16, %c0_17], %19 {strides = array<i32>} : memref<1x6x128xf32, #tpu.memory_space<vmem>>, vector<1x2x128xf32>,
    %c0_18 = arith.constant 0 : index
    %c4 = arith.constant 4 : index
    %c0_19 = arith.constant 0 : index
    %20 = vector.load %arg4[%c0_18, %c4, %c0_19] : memref<1x6x128xf32, #tpu.memory_space<vmem>>, vector<1x2x128xf32>
    %21 = vector.shape_cast %20 : vector<1x2x128xf32> to vector<2x128xf32>
    %cst_20 = arith.constant dense<0.000000e+00> : vector<2x128xf32>
    %22 = vector.multi_reduction <add>, %3, %cst_20 [1] : vector<2x8x128xf32> to vector<2x128xf32>
    %23 = arith.addf %21, %22 : vector<2x128xf32>
    %c0_21 = arith.constant 0 : index
    %c4_22 = arith.constant 4 : index
    %c0_23 = arith.constant 0 : index
    %24 = vector.load %arg4[%c0_21, %c4_22, %c0_23] : memref<1x6x128xf32, #tpu.memory_space<vmem>>, vector<1x2x128xf32>
    %25 = vector.shape_cast %24 : vector<1x2x128xf32> to vector<2x128xf32>
    %26 = vector.shape_cast %23 : vector<2x128xf32> to vector<1x2x128xf32>
    tpu.vector_store %arg4[%c0_21, %c4_22, %c0_23], %26 {strides = array<i32>} : memref<1x6x128xf32, #tpu.memory_space<vmem>>, vector<1x2x128xf32>,
    return
  }
  func.func @transform_0(%arg0: i32, %arg1: i32) -> (i32, i32, i32) {
    %c1_i32 = arith.constant 1 : i32
    %0 = arith.muli %arg0, %c1_i32 : i32
    %1 = arith.addi %0, %arg1 : i32
    %c0_i32 = arith.constant 0 : i32
    %c0_i32_0 = arith.constant 0 : i32
    %c0_i32_1 = arith.constant 0 : i32
    return %c0_i32, %1, %c0_i32_0 : i32, i32, i32
  }
  func.func @transform_1(%arg0: i32, %arg1: i32) -> (i32, i32, i32) {
    %c1_i32 = arith.constant 1 : i32
    %0 = arith.muli %arg0, %c1_i32 : i32
    %1 = arith.addi %0, %arg1 : i32
    %c0_i32 = arith.constant 0 : i32
    %c0_i32_0 = arith.constant 0 : i32
    %c0_i32_1 = arith.constant 0 : i32
    return %c0_i32, %1, %c0_i32_0 : i32, i32, i32
  }
  func.func @transform_2(%arg0: i32, %arg1: i32) -> (i32, i32, i32) {
    %c0_i32 = arith.constant 0 : i32
    %c0_i32_0 = arith.constant 0 : i32
    %c0_i32_1 = arith.constant 0 : i32
    return %arg0, %c0_i32, %c0_i32_0 : i32, i32, i32
  }
}

</mosaic_0001>

<bundles_post_ra>
// kernel: tpu_custom_call.1
= control target key start
LH: loop header
LB: loop body
LE: loop exit
PB: predicated region body
PF: predicated region fallthrough
CT: control target
= control target key end

     0   :  { %7 = vsyncpa [#allocation3], 0  ;;  %s218_s0 = inlined_call_operand.hbm [shape: f32[2,8,128], index: 0, kind: input, shape index: {}]   ;;  %s219_s1 = inlined_call_operand.hbm [shape: f32[2,8,128], index: 1, kind: input, shape index: {}]   ;;  %s220_s2 = inlined_call_operand.vmem [shape: f32[1,6,128], index: 2, kind: output, shape index: {}]  }
   0x1   :  { %8 = vsyncpa [#allocation5], 0  ;;  %s171_s9 = smov [#allocation2]  }
   0x2   :  { %s17_s10 = sshll.u32 %s171_s9, 4  ;;  %s18_s10 = int_to_ptr.vmem [resolvable:$true] %s17_s10 }
   0x3   :  { %s135_s11 = scalar_lea.vmem %s18_s10, 256  ;;  %p140_p1 = scmp.lt.s32.totalorder %s18_s10, %s18_s10 }
   0x4   :  { %p136_p0 = scmp.ne.s32.totalorder %s18_s10, %s135_s11  ;;  %p141_p2 = scmp.lt.s32.totalorder %s135_s11, %s135_s11 }
   0x6   :  { %p142_p3 = por %p141_p2, %p140_p1 }
   0x8   :  { %p143_p4 = pnand %p142_p3, %p136_p0 }
   0xa   :  { %146 = shalt.err (!%p143_p4)
}
   0xb   :  { %s172_s12 = smov 128   ;;  %s173_s13 = smov 8  }
   0xc   :  { %23 = dma.hbm_to_vmem [thread:$0]  %s218_s0, 256, %s18_s10, [#allocation3], %s172_s12, %s172_s12, %s173_s13  }
   0xd   :  { %s174_s16 = smov [#allocation4]  }
   0xe   :  { %s32_s17 = sshll.u32 %s174_s16, 4  ;;  %s33_s17 = int_to_ptr.vmem [resolvable:$true] %s32_s17 }
   0xf   :  { %s155_s18 = scalar_lea.vmem %s33_s17, 256  ;;  %p160_p6 = scmp.lt.s32.totalorder %s33_s17, %s33_s17 }
  0x10   :  { %p156_p5 = scmp.ne.s32.totalorder %s33_s17, %s155_s18  ;;  %p161_p7 = scmp.lt.s32.totalorder %s155_s18, %s155_s18 }
  0x12   :  { %p162_p8 = por %p161_p7, %p160_p6 }
  0x14   :  { %p163_p9 = pnand %p162_p8, %p156_p5 }
  0x16   :  { %166 = shalt.err (!%p163_p9)
}
  0x17   :  { %38 = dma.hbm_to_vmem [thread:$0]  %s219_s1, 256, %s33_s17, [#allocation5], %s172_s12, %s172_s12, %s173_s13  }
  0x18   :  { %167 = dma.done.wait [#allocation3], 256  }
  0x19   :  { %168 = vsyncadd [#allocation3], 4294967040 }
  0x1a   :  { %169 = dma.done.wait [#allocation5], 256  }
  0x1b   :  { %170 = vsyncadd [#allocation5], 4294967040  ;;  %v175_v0 = vmov 0.0   ;;  %v52_v1 = vld [vmem:[#allocation4] sm:$0xff]  ;;  %v53_v2 = vld [vmem:[#allocation4 + $0x8] sm:$0xff]  ;;  %vm73_vm0 = vcmask 1041409  }
  0x1c   :  { %51 = vst [vmem:[%s220_s2] sm:$0x3f] %v175_v0  ;;  %v54_v3 = vld [vmem:[#allocation2] sm:$0xff]  ;;  %v55_v4 = vld [vmem:[#allocation2 + $0x8] sm:$0xff]  ;;  %v98_v9 = vrot.slane %v52_v1, 4  ;;  %v104_v10 = vrot.slane %v53_v2, 4 }
  0x1d   :  { %v57_v5 = vmul.f32 %v54_v3, %v52_v1  ;;  %v79_v6 = vrot.slane %v54_v3, 4  ;;  %v58_v7 = vmul.f32 %v55_v4, %v53_v2  ;;  %v85_v8 = vrot.slane %v55_v4, 4 }
  0x1e   :  { %v99_v15 = vadd.f32 %v98_v9, %v52_v1  ;;  %v105_v16 = vadd.f32 %v104_v10, %v53_v2 }
  0x1f   :  { %v59_v11 = vrot.slane %v57_v5, 4  ;;  %v80_v12 = vadd.f32 %v79_v6, %v54_v3  ;;  %v65_v13 = vrot.slane %v58_v7, 4  ;;  %v86_v14 = vadd.f32 %v85_v8, %v55_v4 }
  0x20   :  { %v100_v21 = vrot.slane %v99_v15, 2  ;;  %v106_v22 = vrot.slane %v105_v16, 2 }
  0x21   :  { %v60_v17 = vadd.f32 %v59_v11, %v57_v5  ;;  %v81_v18 = vrot.slane %v80_v12, 2  ;;  %v66_v19 = vadd.f32 %v65_v13, %v58_v7  ;;  %v87_v20 = vrot.slane %v86_v14, 2 }
  0x22   :  { %v101_v27 = vadd.f32 %v100_v21, %v99_v15  ;;  %v107_v28 = vadd.f32 %v106_v22, %v105_v16 }
  0x23   :  { %v61_v23 = vrot.slane %v60_v17, 2  ;;  %v82_v24 = vadd.f32 %v81_v18, %v80_v12  ;;  %v67_v25 = vrot.slane %v66_v19, 2  ;;  %v88_v26 = vadd.f32 %v87_v20, %v86_v14  ;;  %v78_v38 = vld [vmem:[%s220_s2 + $0x2] sm:$0x3]  ;;  %v97_v40 = vld [vmem:[%s220_s2 + $0x4] sm:$0x3] }
  0x24   :  { %v102_v33 = vrot.slane %v101_v27, 1  ;;  %v108_v34 = vrot.slane %v107_v28, 1  ;;  %v56_v44 = vld [vmem:[%s220_s2] sm:$0x3] }
  0x25   :  { %v62_v29 = vadd.f32 %v61_v23, %v60_v17  ;;  %v83_v30 = vrot.slane %v82_v24, 1  ;;  %v68_v31 = vadd.f32 %v67_v25, %v66_v19  ;;  %v89_v32 = vrot.slane %v88_v26, 1 }
  0x26   :  { %v103_v41 = vadd.f32 %v102_v33, %v101_v27  ;;  %v109_v42 = vadd.f32 %v108_v34, %v107_v28 }
  0x27   :  { %v63_v35 = vrot.slane %v62_v29, 1  ;;  %v84_v36 = vadd.f32 %v83_v30, %v82_v24  ;;  %v69_v37 = vrot.slane %v68_v31, 1  ;;  %v90_v39 = vadd.f32 %v89_v32, %v88_v26 }
  0x28   :  { %v112_v47 = vsel %vm73_vm0, %v109_v42, %v103_v41 }
  0x29   :  { %v64_v43 = vadd.f32 %v63_v35, %v62_v29  ;;  %v70_v45 = vadd.f32 %v69_v37, %v68_v31  ;;  %v93_v46 = vsel %vm73_vm0, %v90_v39, %v84_v36  ;;  %v114_v49 = vadd.f32 %v112_v47, %v97_v40 }
  0x2a   :  { %v95_v48 = vadd.f32 %v93_v46, %v78_v38 }
  0x2b   :  { %v74_v50 = vsel %vm73_vm0, %v70_v45, %v64_v43  ;;  %115 = vst [vmem:[%s220_s2 + $0x4] sm:$0x3] %v114_v49 }
  0x2c   :  { %v76_v51 = vadd.f32 %v74_v50, %v56_v44  ;;  %96 = vst [vmem:[%s220_s2 + $0x2] sm:$0x3] %v95_v48 }
  0x2e   :  { %77 = vst [vmem:[%s220_s2] sm:$0x3] %v76_v51 }
  0x2f   :  { %120 = vsyncpa [#allocation3], 1 }
  0x30   :  { %121 = vsyncpa [#allocation5], 1 }

</bundles_post_ra>
